<compile_context>
chip_gen: v6e
topology: v6e:2x2x1
jax: 0.10.0
libtpu: 0.0.40
codegen_flags: <defaults>
</compile_context>

<pallas_src>
import functools

import jax
import jax.numpy as jnp
from jax.experimental import pallas as pl
from jax.experimental.pallas import tpu as pltpu


def _round_up(x, m):
    return ((x + m - 1) // m) * m


def _choose_tm(M):
    """Tile size for the M (win_len) axis.

    - Full-block path for small M (block shape == array shape, no (8,128)
      divisibility needed).
    - Otherwise a multiple of 128 (satisfies both the (TM,160) input block's
      sublane rule and the (1,TM) output block's lane rule), targeting ~8 grid
      steps and capped at 4096 so the double-buffered X tiles stay ~8 MiB.
    """
    if M <= 128:
        return M
    tm = _round_up(pl.cdiv(M, 8), 128)
    return max(128, min(tm, 4096))


def _mlp_kernel(x_ref, w1_ref, b1_ref, w2_ref, b2_ref, o_ref):
    # x_ref : (TM, 160)  w1_ref : (160, 64)  b1_ref : (1, 64)
    # w2_ref: (1, 64)    b2_ref : (1, 1) in SMEM      o_ref : (1, TM)
    x = x_ref[...]

    # Linear(160 -> 64) on the MXU (f32 accumulate) + bias + ReLU.
    h = jnp.dot(x, w1_ref[...], preferred_element_type=jnp.float32) + b1_ref[...]
    h = jnp.maximum(h, 0.0)

    # Dropout(0.5): identity at inference time.

    # Linear(64 -> 1) as VPU multiply + lane reduction (avoid N=1 MXU pass).
    y = jnp.sum(h * w2_ref[...], axis=-1) + b2_ref[0, 0]        # (TM,)

    # Exact sigmoid; exp lands on the EUP, the divide is free under the DMA
    # shadow (kernel is HBM-bound).
    sig = 1.0 / (1.0 + jnp.exp(-y))                              # (TM,)

    # Lane-dense store: one (1, TM) row per grid step (masked on the tail).
    o_ref[...] = sig.reshape(1, -1).astype(o_ref.dtype)


@functools.partial(jax.jit, static_argnames=())
def net_forward(x, w1, b1, w2, b2):
    """x: (win_len, batch_size, enose_dim) with batch_size*enose_dim == 160."""
    win_len = x.shape[0]
    x2d = x.reshape(win_len, -1).astype(jnp.float32)             # (M, 160)
    M, K = x2d.shape
    H = w1.shape[1]                                              # 64

    # Parameter plumbing (tiny, one HBM pass each; X is never copied).
    w1_f = w1.astype(jnp.float32)                                # (160, 64)
    b1_row = b1.reshape(1, H).astype(jnp.float32)                # (1, 64)
    w2_row = w2.reshape(1, H).astype(jnp.float32)                # (1, 64)
    b2_s = b2.reshape(1, 1).astype(jnp.float32)                  # (1, 1) -> SMEM

    TM = _choose_tm(M)
    grid = (pl.cdiv(M, TM),)                                     # partial last tile OK

    cost = pl.CostEstimate(
        flops=2 * M * K * H + 2 * M * H,
        transcendentals=M,
        bytes_accessed=4 * (M * K + K * H + 2 * H + 1 + M),
    )

    out_row = pl.pallas_call(
        _mlp_kernel,
        out_shape=jax.ShapeDtypeStruct((1, M), jnp.float32),
        grid=grid,
        in_specs=[
            pl.BlockSpec((TM, K), lambda i: (i, 0)),             # X tile
            pl.BlockSpec((K, H), lambda i: (0, 0)),              # W1 resident
            pl.BlockSpec((1, H), lambda i: (0, 0)),              # b1 resident
            pl.BlockSpec((1, H), lambda i: (0, 0)),              # w2 row resident
            pl.BlockSpec(memory_space=pltpu.MemorySpace.SMEM),   # b2 scalar
        ],
        out_specs=pl.BlockSpec((1, TM), lambda i: (0, i)),       # lane-dense out
        compiler_params=pltpu.CompilerParams(
            dimension_semantics=("parallel",)
        ),
        cost_estimate=cost,
    )(x2d, w1_f, b1_row, w2_row, b2_s)

    # Back to the module's (win_len, 1) layout.
    return out_row[0, :].reshape(M, 1)


def _xavier_uniform(key, fan_in, fan_out, gain=1.0):
    # Matches torch.nn.init.xavier_uniform_ for a (fan_out, fan_in) weight,
    # generated directly in (fan_in, fan_out) transposed layout.
    limit = gain * (6.0 / (fan_in + fan_out)) ** 0.5
    return jax.random.uniform(
        key, (fan_in, fan_out), dtype=jnp.float32, minval=-limit, maxval=limit
    )


def init_params(key):
    k1, k2, k3, k4 = jax.random.split(key, 4)
    in_dim, hidden, out_dim = 160, 64, 1
    w1 = _xavier_uniform(k1, in_dim, hidden)                     # (160, 64)
    w2 = _xavier_uniform(k2, hidden, out_dim)                    # (64, 1)
    # nn.Linear default bias init: U(-1/sqrt(fan_in), 1/sqrt(fan_in))
    b1_bound = 1.0 / (in_dim ** 0.5)
    b2_bound = 1.0 / (hidden ** 0.5)
    b1 = jax.random.uniform(k3, (1, hidden), jnp.float32, -b1_bound, b1_bound)
    b2 = jax.random.uniform(k4, (1, out_dim), jnp.float32, -b2_bound, b2_bound)
    return w1, b1, w2, b2


def _reference(x, w1, b1, w2, b2):
    x2d = x.reshape(x.shape[0], -1)
    return jax.nn.sigmoid(jnp.maximum(x2d @ w1 + b1, 0.0) @ w2 + b2)


if __name__ == "__main__":
    key = jax.random.PRNGKey(0)
    k_params, k_x1, k_x2 = jax.random.split(key, 3)

    w1, b1, w2, b2 = init_params(k_params)

    # Small shape consistent with the module: (win_len, batch, enose), batch*enose=160.
    win_len, batch_size, enose_dim = 8, 10, 16
    x_small = jax.random.normal(
        k_x1, (win_len, batch_size, enose_dim), dtype=jnp.float32
    )
    out_small = jax.block_until_ready(net_forward(x_small, w1, b1, w2, b2))
    ref_small = _reference(x_small, w1, b1, w2, b2)
    assert out_small.shape == (win_len, 1)
    assert jnp.allclose(out_small, ref_small, atol=1e-5, rtol=1e-5)

    # Larger win_len exercising the tiled path with a partial last tile
    # (M=300 -> TM=128, grid=3, last tile masked).
    win_len2 = 300
    x_big = jax.random.normal(
        k_x2, (win_len2, batch_size, enose_dim), dtype=jnp.float32
    )
    out_big = jax.block_until_ready(net_forward(x_big, w1, b1, w2, b2))
    ref_big = _reference(x_big, w1, b1, w2, b2)
    assert out_big.shape == (win_len2, 1)
    assert jnp.allclose(out_big, ref_big, atol=1e-5, rtol=1e-5)

    print("KERNEL_OK")
</pallas_src>

<mosaic_0001>
module attributes {stable_mosaic.version = 11 : i64} {
  func.func @_mlp_kernel(%arg0: i32, %arg1: memref<8x160xf32, #tpu.memory_space<vmem>>, %arg2: memref<160x64xf32, #tpu.memory_space<vmem>>, %arg3: memref<1x64xf32, #tpu.memory_space<vmem>>, %arg4: memref<1x64xf32, #tpu.memory_space<vmem>>, %arg5: memref<1x1xf32, #tpu.memory_space<smem>>, %arg6: memref<1x8xf32, #tpu.memory_space<vmem>>) attributes {dimension_semantics = [#tpu.dimension_semantics<parallel>], iteration_bounds = array<i64: 1>, scalar_prefetch = 0 : i64, scratch_operands = 0 : i64, tpu.core_type = #tpu.core_type<tc>, window_params = [{transform_indices = @transform_0, window_bounds = array<i64: 8, 160>}, {pipeline_mode = #tpu.pipeline_mode<synchronous>, transform_indices = @transform_1, window_bounds = array<i64: 160, 64>}, {pipeline_mode = #tpu.pipeline_mode<synchronous>, transform_indices = @transform_2, window_bounds = array<i64: 1, 64>}, {pipeline_mode = #tpu.pipeline_mode<synchronous>, transform_indices = @transform_3, window_bounds = array<i64: 1, 64>}, {transform_indices = @transform_4, window_bounds = array<i64: 1, 1>}, {transform_indices = @transform_5, window_bounds = array<i64: 1, 8>}]} {
    %c0 = arith.constant 0 : index
    %c0_0 = arith.constant 0 : index
    %0 = vector.load %arg1[%c0, %c0_0] : memref<8x160xf32, #tpu.memory_space<vmem>>, vector<8x160xf32>
    %c0_1 = arith.constant 0 : index
    %c0_2 = arith.constant 0 : index
    %1 = vector.load %arg2[%c0_1, %c0_2] : memref<160x64xf32, #tpu.memory_space<vmem>>, vector<160x64xf32>
    %cst = arith.constant dense<0.000000e+00> : vector<8x64xf32>
    %2 = tpu.matmul %0, %1, %cst {dimension_numbers = #tpu.dot_dimension_numbers<[1], [0], [0], [1], [0, 0, 1, 1], [], []>} : vector<8x160xf32>, vector<160x64xf32>, vector<8x64xf32> -> vector<8x64xf32>
    %c0_3 = arith.constant 0 : index
    %c0_4 = arith.constant 0 : index
    %3 = vector.load %arg3[%c0_3, %c0_4] : memref<1x64xf32, #tpu.memory_space<vmem>>, vector<1x64xf32>
    %4 = vector.broadcast %3 : vector<1x64xf32> to vector<8x64xf32>
    %5 = arith.addf %2, %4 : vector<8x64xf32>
    %cst_5 = arith.constant 0.000000e+00 : f32
    %6 = vector.broadcast %cst_5 : f32 to vector<8x64xf32>
    %7 = arith.maximumf %5, %6 : vector<8x64xf32>
    %c0_6 = arith.constant 0 : index
    %c0_7 = arith.constant 0 : index
    %8 = vector.load %arg4[%c0_6, %c0_7] : memref<1x64xf32, #tpu.memory_space<vmem>>, vector<1x64xf32>
    %9 = vector.broadcast %8 : vector<1x64xf32> to vector<8x64xf32>
    %10 = arith.mulf %7, %9 : vector<8x64xf32>
    %cst_8 = arith.constant dense<0.000000e+00> : vector<8xf32>
    %11 = vector.multi_reduction <add>, %10, %cst_8 [1] : vector<8x64xf32> to vector<8xf32>
    %c0_9 = arith.constant 0 : index
    %c0_10 = arith.constant 0 : index
    %12 = memref.load %arg5[%c0_9, %c0_10] : memref<1x1xf32, #tpu.memory_space<smem>>
    %13 = vector.broadcast %12 : f32 to vector<8xf32>
    %14 = arith.addf %11, %13 : vector<8xf32>
    %cst_11 = arith.constant 0.000000e+00 : f32
    %15 = vector.broadcast %cst_11 : f32 to vector<8xf32>
    %16 = arith.subf %15, %14 : vector<8xf32>
    %17 = math.exp %16 : vector<8xf32>
    %cst_12 = arith.constant 1.000000e+00 : f32
    %18 = vector.broadcast %cst_12 : f32 to vector<8xf32>
    %19 = arith.addf %18, %17 : vector<8xf32>
    %cst_13 = arith.constant 1.000000e+00 : f32
    %20 = vector.broadcast %cst_13 : f32 to vector<8xf32>
    %21 = arith.divf %20, %19 : vector<8xf32>
    %22 = vector.shape_cast %21 : vector<8xf32> to vector<1x8xf32>
    %c0_14 = arith.constant 0 : index
    %c0_15 = arith.constant 0 : index
    %23 = vector.load %arg6[%c0_14, %c0_15] : memref<1x8xf32, #tpu.memory_space<vmem>>, vector<1x8xf32>
    tpu.vector_store %arg6[%c0_14, %c0_15], %22 {strides = array<i32>} : memref<1x8xf32, #tpu.memory_space<vmem>>, vector<1x8xf32>,
    return
  }
  func.func @transform_0(%arg0: i32) -> (i32, i32) {
    %c0_i32 = arith.constant 0 : i32
    %c0_i32_0 = arith.constant 0 : i32
    return %arg0, %c0_i32 : i32, i32
  }
  func.func @transform_1(%arg0: i32) -> (i32, i32) {
    %c0_i32 = arith.constant 0 : i32
    %c0_i32_0 = arith.constant 0 : i32
    %c0_i32_1 = arith.constant 0 : i32
    return %c0_i32, %c0_i32_0 : i32, i32
  }
  func.func @transform_2(%arg0: i32) -> (i32, i32) {
    %c0_i32 = arith.constant 0 : i32
    %c0_i32_0 = arith.constant 0 : i32
    %c0_i32_1 = arith.constant 0 : i32
    return %c0_i32, %c0_i32_0 : i32, i32
  }
  func.func @transform_3(%arg0: i32) -> (i32, i32) {
    %c0_i32 = arith.constant 0 : i32
    %c0_i32_0 = arith.constant 0 : i32
    %c0_i32_1 = arith.constant 0 : i32
    return %c0_i32, %c0_i32_0 : i32, i32
  }
  func.func @transform_4(%arg0: i32) -> (i32, i32) {
    %c0_i32 = arith.constant 0 : i32
    %c0_i32_0 = arith.constant 0 : i32
    %c0_i32_1 = arith.constant 0 : i32
    return %c0_i32, %c0_i32_0 : i32, i32
  }
  func.func @transform_5(%arg0: i32) -> (i32, i32) {
    %c0_i32 = arith.constant 0 : i32
    %c0_i32_0 = arith.constant 0 : i32
    return %c0_i32, %arg0 : i32, i32
  }
}

</mosaic_0001>

<bundles_post_ra>
// kernel: net_forward.1
= control target key start
LH: loop header
LB: loop body
LE: loop exit
PB: predicated region body
PF: predicated region fallthrough
CT: control target
= control target key end

     0   :  { %v202_v1 = vmov 0.0   ;;  %vm51_vm0 = vcmask 261120   ;;  %s312_s0 = inlined_call_operand.vmem [shape: f32[8,160], index: 0, kind: input, shape index: {}]   ;;  %s313_s1 = inlined_call_operand.vmem [shape: f32[160,64], index: 1, kind: input, shape index: {}]   ;;  %s314_s2 = inlined_call_operand.vmem [shape: f32[1,64], index: 2, kind: input, shape index: {}]   ;;  %s315_s3 = inlined_call_operand.vmem [shape: f32[1,64], index: 3, kind: input, shape index: {}]   ;;  %s316_s4 = inlined_call_operand.<no memory space> [shape: f32[1,1], index: 4, kind: input, shape index: {}]   ;;  %s317_s5 = inlined_call_operand.hbm [shape: f32[1,8], index: 5, kind: output, shape index: {}]  }
   0x1   :  { %v39_v0 = vld [vmem:[%s313_s1 + $0x78] sm:$0xff]  ;;  %55 = vmatprep.subr.mxu0 %v202_v1  ;;  %v38_v2 = vld [vmem:[%s313_s1 + $0x70] sm:$0xff]  ;;  %v37_v3 = vld [vmem:[%s313_s1 + $0x68] sm:$0xff] }
   0x2   :  { %56 = vmatpush1.msra.mxu0 %v39_v0  ;;  %v36_v4 = vld [vmem:[%s313_s1 + $0x60] sm:$0xff]  ;;  %v23_v5 = vld [vmem:[%s312_s0 + $0x8] sm:$0xff]  ;;  %v35_v6 = vld [vmem:[%s313_s1 + $0x58] sm:$0xff] }
   0x3   :  { %57 = vmatprep.subr.mxu0 %v202_v1  ;;  %172 = vmatprep.mubr.msk.f32.mxu0 %vm51_vm0, %v23_v5 }
   0x4   :  { %58 = vmatpush1.msra.mxu0 %v38_v2 }
   0x5   :  { %59 = vmatprep.subr.mxu0 %v202_v1 }
   0x6   :  { %60 = vmatpush1.msra.mxu0 %v37_v3 }
   0x7   :  { %61 = vmatprep.subr.mxu0 %v202_v1 }
   0x8   :  { %11 = vsyncpa [#allocation4], 0  ;;  %62 = vmatpush1.msra.mxu0 %v36_v4  ;;  %v34_v7 = vld [vmem:[%s313_s1 + $0x50] sm:$0xff]  ;;  %v33_v8 = vld [vmem:[%s313_s1 + $0x48] sm:$0xff]  ;;  %vm134_vm1 = vcmask 523264   ;;  %v139_v31 = vstv %s316_s4  ;;  %v148_v38 = vlaneseq  ;;  %vm155_vm2 = vcmask 57344  }
   0x9   :  { %63 = vmatprep.subr.mxu0 %v202_v1  ;;  %v32_v9 = vld [vmem:[%s313_s1 + $0x40] sm:$0xff]  ;;  %v31_v10 = vld [vmem:[%s313_s1 + $0x38] sm:$0xff]  ;;  %v30_v11 = vld [vmem:[%s313_s1 + $0x30] sm:$0xff] }
   0xa   :  { %64 = vmatpush1.msra.mxu0 %v35_v6  ;;  %v29_v12 = vld [vmem:[%s313_s1 + $0x28] sm:$0xff]  ;;  %v28_v13 = vld [vmem:[%s313_s1 + $0x20] sm:$0xff]  ;;  %v27_v14 = vld [vmem:[%s313_s1 + $0x18] sm:$0xff]  ;;  %v149_v39 = vand.u32 127, %v148_v38  ;;  %v151_v40 = vshrl.u32 %v148_v38, 7 }
   0xb   :  { %65 = vmatprep.subr.mxu0 %v202_v1  ;;  %v26_v15 = vld [vmem:[%s313_s1 + $0x10] sm:$0xff]  ;;  %v25_v16 = vld [vmem:[%s313_s1 + $0x8] sm:$0xff]  ;;  %v24_v17 = vld [vmem:[%s313_s1] sm:$0xff] }
   0xc   :  { %66 = vmatpush1.msra.mxu0 %v34_v7  ;;  %v43_v18 = vld [vmem:[%s313_s1 + $0x98] sm:$0xff]  ;;  %v42_v19 = vld [vmem:[%s313_s1 + $0x90] sm:$0xff]  ;;  %v41_v20 = vld [vmem:[%s313_s1 + $0x88] sm:$0xff]  ;;  %v152_v41 = vsub.s32 %v149_v39, %v151_v40 }
   0xd   :  { %67 = vmatprep.subr.mxu0 %v202_v1  ;;  %v40_v21 = vld [vmem:[%s313_s1 + $0x80] sm:$0xff] }
   0xe   :  { %68 = vmatpush1.msra.mxu0 %v33_v8  ;;  %v22_v22 = vld [vmem:[%s312_s0] sm:$0xff] }
   0xf   :  { %69 = vmatprep.subr.mxu0 %v202_v1  ;;  %v171_v23 = vld [vmem:[%s314_s2] ss:$0 sm:$0xff]  ;;  %s203_s2 = smov [#allocation3]  }
  0x10   :  { %70 = vmatpush1.msra.mxu0 %v32_v9  ;;  %v173_v27 = vld [vmem:[%s315_s3] ss:$0 sm:$0xff]  ;;  %s163_s3 = sshll.u32 %s203_s2, 4  ;;  %s164_s3 = int_to_ptr.vmem [resolvable:$true] %s163_s3 }
  0x11   :  { %71 = vmatprep.subr.mxu0 %v202_v1  ;;  %s180_s4 = scalar_lea.vmem %s164_s3, 16  ;;  %s184_s16 = scalar_lea.vmem %s164_s3, 32 }
  0x12   :  { %72 = vmatpush1.msra.mxu0 %v31_v10  ;;  %p181_p0 = scmp.ne.s32.totalorder %s164_s3, %s180_s4  ;;  %p185_p1 = scmp.lt.s32.totalorder %s164_s3, %s164_s3 }
  0x13   :  { %73 = vmatprep.subr.mxu0 %v202_v1  ;;  %p186_p2 = scmp.lt.s32.totalorder %s184_s16, %s180_s4 }
  0x14   :  { %74 = vmatpush1.msra.mxu0 %v30_v11 }
  0x15   :  { %75 = vmatprep.subr.mxu0 %v202_v1  ;;  %p187_p3 = por %p186_p2, %p185_p1 }
  0x16   :  { %76 = vmatpush1.msra.mxu0 %v29_v12 }
  0x17   :  { %77 = vmatprep.subr.mxu0 %v202_v1  ;;  %p188_p4 = pnand %p187_p3, %p181_p0 }
  0x18   :  { %78 = vmatpush1.msra.mxu0 %v28_v13 }
  0x19   :  { %79 = vmatprep.subr.mxu0 %v202_v1 }
  0x1a   :  { %80 = vmatpush1.msra.mxu0 %v27_v14 }
  0x1b   :  { %81 = vmatprep.subr.mxu0 %v202_v1 }
  0x1c   :  { %82 = vmatpush1.msra.mxu0 %v26_v15 }
  0x1d   :  { %83 = vmatprep.subr.mxu0 %v202_v1 }
  0x1e   :  { %84 = vmatpush1.msra.mxu0 %v25_v16 }
  0x1f   :  { %85 = vmatprep.subr.mxu0 %v202_v1 }
  0x20   :  { %86 = vmatpush1.msra.mxu0 %v24_v17 }
  0x21   :  { %111 = vmatprep.subr.mxu0 %v202_v1 }
  0x22   :  { %112 = vmatpush2.msra.mxu0 %v43_v18 }
  0x23   :  { %113 = vmatprep.subr.mxu0 %v202_v1 }
  0x24   :  { %114 = vmatpush2.msra.mxu0 %v42_v19 }
  0x25   :  { %115 = vmatprep.subr.mxu0 %v202_v1 }
  0x26   :  { %116 = vmatpush2.msra.mxu0 %v41_v20 }
  0x27   :  { %117 = vmatprep.subr.mxu0 %v202_v1 }
  0x28   :  { %118 = vmatpush2.msra.mxu0 %v40_v21 }
  0x29   :  { %120 = vmatmul.mubr.f32.vlgmr.msra.gmra.mxu0 %v22_v22 }
  0xe9   :  { %v121_v24 = vpop.f32.mrf.mxu0 }
  0xea   :  { %v122_v25 = vadd.f32 %v171_v23, %v121_v24 }
  0xeb   :  { %v123_v26 = vpop.f32.mrf.mxu0 }
  0xec   :  { %v125_v28 = vmax.f32 %v122_v25, 0.0 }
  0xee   :  { %v133_v29 = vmul.f32 %v173_v27, %v125_v28 }
  0xf0   :  { %v135_v30 = vsel %vm134_vm1, %v133_v29, 0.0 }
  0xf1   :  { %136 = vadd.xlane.f32.xlu0 %v135_v30 }
 0x17a   :  { %v137_v32 = vpop.xlane.xlu0 %136 }
 0x17b   :  { %v140_v33 = vadd.f32 %v139_v31, %v137_v32 }
 0x17d   :  { %v141_v34 = vsub.f32 0.0, %v140_v33 }
 0x17f   :  { %v142_v35 = vmul.f32 1.442695, %v141_v34 }
 0x181   :  { %176 = vpow2.f32 %v142_v35 }
 0x18e   :  { %v177_v36 = vpop.eup %176 }
 0x18f   :  { %v144_v37 = vadd.f32 1.0, %v177_v36 }
 0x191   :  { %178 = vrcp.f32 %v144_v37 }
 0x19e   :  { %v179_v42 = vpop.eup %178 }
 0x19f   :  { %v153_v43 = vrot.slane %v179_v42, %v152_v41 }
 0x1a1   :  { %156 = vst.msk [vmem:[#allocation3] sm:$0x1] %vm155_vm2, %v153_v43 }
 0x1a2   :  { %191 = shalt.err (!%p188_p4)
}
 0x1a3   :  { %166 = dma.vmem_to_hbm [thread:$0]  %s164_s3, 16, %s317_s5, [#allocation4]  }
 0x1a4   :  { %200 = dma.done.wait [#allocation4], 16  }
 0x1a5   :  { %201 = vsyncadd [#allocation4], 4294967280 }
 0x1a6   :  { %170 = vsyncpa [#allocation4], 1 }

</bundles_post_ra>
